<compile_context>
chip_gen: v5e
topology: v5e:2x2
jax: 0.10.0
libtpu: 0.0.40
codegen_flags: <defaults>
</compile_context>

<pallas_src>
import functools

import jax
import jax.numpy as jnp
from jax.experimental import pallas as pl
from jax.experimental.pallas import tpu as pltpu


_NEG_BIG = -1e30  # bias for padded vocab lanes: exp underflows to 0, representable in bf16


def _round_up(x, m):
    return ((x + m - 1) // m) * m


def _make_mask_lm_kernel(use_cache, cache_dtype):
    """Two-phase streamed log-softmax(x @ W + b) over vocab tiles.

    grid = (row_tiles, 2 phases, vocab_tiles)
      phase 0: compute logits tile (optionally cache it in VMEM), accumulate online
               running-max / running-sum-exp into [tm, 1] scratch
      phase 1: read the cached tile (or recompute it), write (logits - logsumexp)
               lane-dense, exactly once per output tile
    """

    def kernel(x_ref, w_ref, b_ref, out_ref, m_sc, l_sc, *cache):
        cache_sc = cache[0] if use_cache else None
        p = pl.program_id(1)   # phase: 0 = reduce, 1 = write
        j = pl.program_id(2)   # vocab tile index

        def logits_tile():
            # [tm, H](bf16) @ [H, tv](bf16) -> [tm, tv] with f32 accumulation on the MXU.
            acc = jnp.dot(x_ref[...], w_ref[...], preferred_element_type=jnp.float32)
            return acc + b_ref[...]          # [1, tv] f32 bias broadcast over rows

        @pl.when(jnp.logical_and(p == 0, j == 0))
        def _():
            m_sc[...] = jnp.full_like(m_sc, -jnp.inf)
            l_sc[...] = jnp.zeros_like(l_sc)

        @pl.when(p == 0)
        def _():
            logits = logits_tile()
            if use_cache:
                cache_sc[j] = logits.astype(cache_dtype)
            m_prev = m_sc[...]
            m_new = jnp.maximum(m_prev, jnp.max(logits, axis=-1, keepdims=True))
            alpha = jnp.exp(m_prev - m_new)
            l_sc[...] = alpha * l_sc[...] + jnp.sum(jnp.exp(logits - m_new),
                                                    axis=-1, keepdims=True)
            m_sc[...] = m_new

        @pl.when(p == 1)
        def _():
            lse = m_sc[...] + jnp.log(l_sc[...])
            if use_cache:
                logits = cache_sc[j].astype(jnp.float32)
            else:
                logits = logits_tile()
            # NOTE: relies on documented revisit semantics — the (i, 0) output buffer is
            # pinned (never written) during phase 0 and only written back after phase 1
            # has fully overwritten it.  Verified on hardware with multi-tile grids.
            out_ref[...] = (logits - lse).astype(out_ref.dtype)

    return kernel


def prepare_masked_log_params(weight, bias, *, tv=2048):
    """Cast + lane-pad nn.Linear(hidden, vocab) params ONCE, outside the hot path.

    weight: [V, H] (PyTorch Linear layout), bias: [V].
    Returns (w_t [H, Vp] bf16, bias [1, Vp] f32, V) with Vp a multiple of the vocab
    tile.  Padded vocab lanes get a -1e30 bias so they never perturb max / logsumexp.
    """
    V, _H = weight.shape
    tv_eff = _round_up(min(tv, _round_up(V, 128)), 128)
    Vp = _round_up(V, tv_eff)
    w_t = weight.T.astype(jnp.bfloat16)
    bb = bias.astype(jnp.float32)
    if Vp != V:
        w_t = jnp.pad(w_t, ((0, 0), (0, Vp - V)))
        bb = jnp.pad(bb, (0, Vp - V), constant_values=_NEG_BIG)
    return w_t, bb.reshape(1, Vp), V


def prepare_bert_log_params(mask_lm_weight, mask_lm_bias, *, tv=2048):
    """Build a prepared params dict for bert_log_forward (cast/pad done exactly once)."""
    w_t, b2, V = prepare_masked_log_params(mask_lm_weight, mask_lm_bias, tv=tv)
    return {"mask_lm_w_t": w_t, "mask_lm_b": b2, "vocab_size": V}


@functools.partial(
    jax.jit,
    static_argnames=("vocab_size", "tm", "tv", "out_dtype", "cache_logits",
                     "return_padded", "cache_budget_bytes", "weight_buffers"))
def masked_log_model(x, w_t, b, *, vocab_size=None, tm=512, tv=2048,
                     out_dtype=jnp.bfloat16, cache_logits=None, return_padded=False,
                     cache_budget_bytes=32 << 20, weight_buffers=None):
    """log_softmax(x @ w_t + b, axis=-1) with vocab streaming + VMEM logits cache.

    x:   [M, H] flattened tokens (cast to bf16 at the kernel boundary)
    w_t: [H, V] nn.Linear weight transposed (raw), or [H, Vp] bf16 prepared via
         prepare_masked_log_params (preferred — avoids a per-call H*V cast/pad)
    b:   [V] raw, or [1, Vp] prepared
    Returns [M, V] log-probs in `out_dtype` ([Mp, Vp] padded if return_padded=True).

    Tiling guidance:
      v6e/v7x: tm=512, tv=2048, bf16 out (default).  Logits cache ~ tm*Vp*2 bytes
               (~30 MiB for BERT-size vocab at tm=512) -> total working set ~45-50 MiB,
               fits v7x's 64 MiB with the explicit vmem_limit set below.
      v5e:     tm<=256, tv<=2048, bf16 out (16 MiB scoped default; the kernel raises
               vmem_limit_bytes from the working set automatically).
    The [H, V] weight is never held resident: the vocab axis is a streamed grid dim.
    """
    M, H = x.shape
    out_dt = jnp.dtype(out_dtype)

    if b.ndim == 2:
        # Pre-prepared params: bf16 weight [H, Vp], f32 bias [1, Vp], already lane-padded.
        Vp = w_t.shape[1]
        if Vp % 128 != 0:
            raise ValueError("prepared weight must be lane-padded to a multiple of 128")
        V = int(vocab_size) if vocab_size is not None else Vp
        wb = w_t.astype(jnp.bfloat16)      # no-op for already-prepared bf16 params
        b2 = b.astype(jnp.float32)
        tv_eff = min(_round_up(tv, 128), Vp)
        while Vp % tv_eff != 0:            # pick a vocab tile that divides Vp
            tv_eff -= 128
    else:
        # Raw nn.Linear params: cast + pad here.  For repeated calls prefer
        # prepare_masked_log_params once outside the hot path (this re-reads H*V f32).
        V = w_t.shape[1]
        tv_eff = _round_up(min(tv, _round_up(V, 128)), 128)
        Vp = _round_up(V, tv_eff)
        wb = w_t.astype(jnp.bfloat16)
        bb = b.astype(jnp.float32)
        if Vp != V:
            wb = jnp.pad(wb, ((0, 0), (0, Vp - V)))
            bb = jnp.pad(bb, (0, Vp - V), constant_values=_NEG_BIG)
        b2 = bb.reshape(1, Vp)

    # Row tile: clamp small batches UP to 128 padded rows (MXU-sized) rather than
    # dropping to tiny tiles; an explicitly small caller-provided tm is respected.
    tm_eff = min(_round_up(tm, 8), _round_up(M, 128))
    Mp = _round_up(M, tm_eff)

    xb = x.astype(jnp.bfloat16)
    if Mp != M:
        xb = jnp.pad(xb, ((0, Mp - M), (0, 0)))

    nvt = Vp // tv_eff
    out_itemsize = out_dt.itemsize
    # f32 cache when f32 output is requested (precision), bf16 otherwise (VMEM).
    cache_dt = jnp.dtype(jnp.float32) if out_dt == jnp.dtype(jnp.float32) \
        else jnp.dtype(jnp.bfloat16)
    cache_bytes = nvt * tm_eff * tv_eff * cache_dt.itemsize
    use_cache = bool(cache_logits) if cache_logits is not None \
        else (cache_bytes <= cache_budget_bytes)

    grid = (Mp // tm_eff, 2, nvt)

    x_map = lambda i, p, j: (i, 0)            # one x DMA per row tile
    out_map = lambda i, p, j: (i, j * p)      # pinned in phase 0, written once in phase 1
    if use_cache:
        # Phase 1 reads the VMEM cache; pin weight/bias to the last phase-0 block so
        # they are NOT re-streamed -> weight DMA'd exactly once per row tile.
        wv_map = lambda i, p, j: (0, j * (1 - p) + (nvt - 1) * p)
    else:
        wv_map = lambda i, p, j: (0, j)       # streaming-recompute fallback (huge vocab)

    w_spec_kwargs = {}
    if weight_buffers is not None:
        # Optional deeper weight pipelining (helps the recompute path on v6e at tm=256).
        w_spec_kwargs["pipeline_mode"] = pl.Buffered(weight_buffers)

    in_specs = [
        pl.BlockSpec((tm_eff, H), x_map),
        pl.BlockSpec((H, tv_eff), wv_map, **w_spec_kwargs),
        pl.BlockSpec((1, tv_eff), wv_map),
    ]
    out_specs = pl.BlockSpec((tm_eff, tv_eff), out_map)

    scratch_shapes = [pltpu.VMEM((tm_eff, 1), jnp.float32),   # running max
                      pltpu.VMEM((tm_eff, 1), jnp.float32)]   # running sum of exp
    if use_cache:
        scratch_shapes.append(pltpu.VMEM((nvt, tm_eff, tv_eff), cache_dt))

    # Working-set-derived scoped-VMEM limit (avoids the 16/32 MiB scoped defaults
    # silently gating tile choices); floor 16 MiB, cap below physical VMEM.
    wbufs = 2 if weight_buffers is None else int(weight_buffers)
    vmem_need = (2 * tm_eff * H * 2                      # x double buffer (bf16)
                 + wbufs * H * tv_eff * 2                # weight buffers (bf16)
                 + 2 * 8 * tv_eff * 4                    # bias buffers (sublane-padded)
                 + 2 * tm_eff * tv_eff * out_itemsize    # out double buffer
                 + 2 * tm_eff * 128 * 4                  # m/l scratch (lane-padded)
                 + (cache_bytes if use_cache else 0))    # single-buffered logits cache
    vmem_limit = int(min(max(vmem_need + (4 << 20), 16 << 20), 112 << 20))

    matmul_passes = 1 if use_cache else 2
    cost = pl.CostEstimate(
        flops=int(2 * Mp * H * Vp * matmul_passes),
        transcendentals=int(Mp * Vp),
        bytes_accessed=int(Mp * H * 2
                           + (Mp // tm_eff) * H * Vp * 2 * matmul_passes
                           + Vp * 4
                           + Mp * Vp * out_itemsize))

    kernel = _make_mask_lm_kernel(use_cache, cache_dt)

    out = pl.pallas_call(
        kernel,
        out_shape=jax.ShapeDtypeStruct((Mp, Vp), out_dt),
        grid_spec=pltpu.PrefetchScalarGridSpec(
            num_scalar_prefetch=0,
            grid=grid,
            in_specs=in_specs,
            out_specs=out_specs,
            scratch_shapes=scratch_shapes),
        compiler_params=pltpu.CompilerParams(
            # Row axis shards across TensorCores (v7x megacore); phase and vocab axes
            # carry the scratch reduction / cache and must stay sequential per core.
            dimension_semantics=("parallel", "arbitrary", "arbitrary"),
            vmem_limit_bytes=vmem_limit),
        cost_estimate=cost,
    )(xb, wb, b2)

    if return_padded or (Mp == M and Vp == V):
        # Skip the extra full-tensor HBM copy when no padding happened, or when the
        # caller fuses the downstream gather/NLL and handles padded lanes itself.
        return out
    return out[:M, :V]


def bert_log_forward(hidden_states, params, *, out_dtype=jnp.bfloat16, tm=512, tv=2048):
    """Mirror BERTLog.forward result dict (BERT backbone output given directly).

    hidden_states: [B, S, H] — the BERT final output.
    params: prepared dict from prepare_bert_log_params (preferred) or raw
            {"mask_lm_w_t": [H, V], "mask_lm_b": [V]}.
    Returns dict with:
      logkey_output: [B, S, V]  log-softmax of linear projection (Pallas kernel)
      cls_output:    [B, H]     hidden_states[:, 0]
      time_output:   None       (time_lm is not called in BERTLog.forward)
      cls_fnn_output: None
    """
    B, S, H = hidden_states.shape
    w_t, b = params["mask_lm_w_t"], params["mask_lm_b"]
    V = int(params.get("vocab_size", w_t.shape[1]))
    logp = masked_log_model(hidden_states.reshape(B * S, H), w_t, b,
                            vocab_size=V, tm=tm, tv=tv, out_dtype=out_dtype)
    return {
        "logkey_output": logp.reshape(B, S, V),
        "time_output": None,   # TODO(synk): time_lm exists in the module but is unused in forward
        "cls_output": hidden_states[:, 0],
        "cls_fnn_output": None,
    }


if __name__ == "__main__":
    # Small shapes consistent with the module's forward.  V deliberately not a multiple
    # of 128 to exercise vocab padding/masking; custom small tiles exercise multi-row /
    # multi-vocab-tile grids for both the cached and the streaming-recompute kernels.
    B, S, H, V = 4, 8, 32, 250

    key = jax.random.PRNGKey(0)
    kx, kw, kb, kt = jax.random.split(key, 4)

    # PyTorch Linear: weight [V, H], bias [V].
    w = jax.random.normal(kw, (V, H), dtype=jnp.float32) * 0.05
    b = jax.random.normal(kb, (V,), dtype=jnp.float32) * 0.05
    _time_w = jax.random.normal(kt, (1, H), dtype=jnp.float32) * 0.05  # unused in forward

    # Stand-in for BERT final hidden states [B, S, H].
    hidden_states = jax.random.normal(kx, (B, S, H), dtype=jnp.float32)
    x2d = hidden_states.reshape(B * S, H)

    # Reference (inputs/weights go through bf16, matching the kernel's MXU path).
    x_bf = x2d.astype(jnp.bfloat16).astype(jnp.float32)
    w_bf = w.T.astype(jnp.bfloat16).astype(jnp.float32)
    ref_logp = jax.nn.log_softmax(x_bf @ w_bf + b, axis=-1)

    # --- 1) cached-logits kernel (primary path), f32 output, multi-tile grid ---
    logp_cached = jax.block_until_ready(masked_log_model(
        x2d, w.T, b, tm=16, tv=128, out_dtype=jnp.float32, cache_logits=True))
    assert logp_cached.shape == (B * S, V)
    err = float(jnp.max(jnp.abs(logp_cached - ref_logp)))
    assert jnp.allclose(logp_cached, ref_logp, atol=2e-4, rtol=2e-4), \
        "cached path max abs err %.3e" % err

    # --- 2) streaming-recompute fallback kernel (very-large-vocab path), f32 output ---
    logp_stream = jax.block_until_ready(masked_log_model(
        x2d, w.T, b, tm=16, tv=128, out_dtype=jnp.float32, cache_logits=False))
    err = float(jnp.max(jnp.abs(logp_stream - ref_logp)))
    assert jnp.allclose(logp_stream, ref_logp, atol=2e-4, rtol=2e-4), \
        "stream path max abs err %.3e" % err

    # --- 3) full BERTLog head: prepared (bf16, lane-padded) params, bf16 output,
    #        default MXU-sized tiles (bandwidth-optimized inference path) ---
    params = prepare_bert_log_params(w, b)
    result = bert_log_forward(hidden_states, params)
    logkey = jax.block_until_ready(result["logkey_output"])
    cls_out = jax.block_until_ready(result["cls_output"])

    assert logkey.shape == (B, S, V) and logkey.dtype == jnp.bfloat16
    assert cls_out.shape == (B, H)
    assert result["time_output"] is None and result["cls_fnn_output"] is None
    assert jnp.allclose(logkey.astype(jnp.float32).reshape(B * S, V), ref_logp,
                        atol=6e-2, rtol=2e-2)
    assert jnp.allclose(cls_out, hidden_states[:, 0])

    print("KERNEL_OK")
</pallas_src>

<mosaic_0001>
module attributes {stable_mosaic.version = 11 : i64} {
  func.func @kernel(%arg0: i32, %arg1: i32, %arg2: i32, %arg3: memref<16x32xbf16, #tpu.memory_space<vmem>>, %arg4: memref<32x128xbf16, #tpu.memory_space<vmem>>, %arg5: memref<1x128xf32, #tpu.memory_space<vmem>>, %arg6: memref<16x128xf32, #tpu.memory_space<vmem>>, %arg7: memref<16x1xf32, #tpu.memory_space<vmem>>, %arg8: memref<16x1xf32, #tpu.memory_space<vmem>>, %arg9: memref<2x16x128xf32, #tpu.memory_space<vmem>>) attributes {dimension_semantics = [#tpu.dimension_semantics<parallel>, #tpu.dimension_semantics<arbitrary>, #tpu.dimension_semantics<arbitrary>], iteration_bounds = array<i64: 2, 2, 2>, scalar_prefetch = 0 : i64, scratch_operands = 3 : i64, tpu.core_type = #tpu.core_type<tc>, window_params = [{transform_indices = @transform_0, window_bounds = array<i64: 16, 32>}, {transform_indices = @transform_1, window_bounds = array<i64: 32, 128>}, {transform_indices = @transform_2, window_bounds = array<i64: 1, 128>}, {transform_indices = @transform_3, window_bounds = array<i64: 16, 128>}]} {
    %c0_i32 = arith.constant 0 : i32
    %0 = arith.cmpi eq, %arg1, %c0_i32 : i32
    %c0_i32_0 = arith.constant 0 : i32
    %1 = arith.cmpi eq, %arg2, %c0_i32_0 : i32
    %2 = arith.andi %0, %1 : i1
    %3 = arith.extui %2 : i1 to i32
    %c0_i32_1 = arith.constant 0 : i32
    %4 = arith.cmpi ne, %3, %c0_i32_1 : i32
    scf.if %4 {
      %cst = arith.constant 0xFF800000 : f32
      %11 = vector.broadcast %cst : f32 to vector<16x1xf32>
      %c0 = arith.constant 0 : index
      %c0_5 = arith.constant 0 : index
      %12 = vector.load %arg7[%c0, %c0_5] : memref<16x1xf32, #tpu.memory_space<vmem>>, vector<16x1xf32>
      tpu.vector_store %arg7[%c0, %c0_5], %11 {strides = array<i32>} : memref<16x1xf32, #tpu.memory_space<vmem>>, vector<16x1xf32>,
      %cst_6 = arith.constant 0.000000e+00 : f32
      %13 = vector.broadcast %cst_6 : f32 to vector<16x1xf32>
      %c0_7 = arith.constant 0 : index
      %c0_8 = arith.constant 0 : index
      %14 = vector.load %arg8[%c0_7, %c0_8] : memref<16x1xf32, #tpu.memory_space<vmem>>, vector<16x1xf32>
      tpu.vector_store %arg8[%c0_7, %c0_8], %13 {strides = array<i32>} : memref<16x1xf32, #tpu.memory_space<vmem>>, vector<16x1xf32>,
    } else {
    }
    %c0_i32_2 = arith.constant 0 : i32
    %5 = arith.cmpi eq, %arg1, %c0_i32_2 : i32
    %6 = arith.extui %5 : i1 to i32
    %c0_i32_3 = arith.constant 0 : i32
    %7 = arith.cmpi ne, %6, %c0_i32_3 : i32
    scf.if %7 {
      %c0 = arith.constant 0 : index
      %c0_5 = arith.constant 0 : index
      %11 = vector.load %arg3[%c0, %c0_5] : memref<16x32xbf16, #tpu.memory_space<vmem>>, vector<16x32xbf16>
      %c0_6 = arith.constant 0 : index
      %c0_7 = arith.constant 0 : index
      %12 = vector.load %arg4[%c0_6, %c0_7] : memref<32x128xbf16, #tpu.memory_space<vmem>>, vector<32x128xbf16>
      %cst = arith.constant dense<0.000000e+00> : vector<16x128xf32>
      %13 = tpu.matmul %11, %12, %cst {dimension_numbers = #tpu.dot_dimension_numbers<[1], [0], [0], [1], [0, 0, 1, 1], [], []>} : vector<16x32xbf16>, vector<32x128xbf16>, vector<16x128xf32> -> vector<16x128xf32>
      %c0_8 = arith.constant 0 : index
      %c0_9 = arith.constant 0 : index
      %14 = vector.load %arg5[%c0_8, %c0_9] : memref<1x128xf32, #tpu.memory_space<vmem>>, vector<1x128xf32>
      %15 = vector.broadcast %14 : vector<1x128xf32> to vector<16x128xf32>
      %16 = arith.addf %13, %15 : vector<16x128xf32>
      %17 = arith.index_cast %arg2 : i32 to index
      %c0_10 = arith.constant 0 : index
      %c0_11 = arith.constant 0 : index
      %18 = vector.load %arg9[%17, %c0_10, %c0_11] : memref<2x16x128xf32, #tpu.memory_space<vmem>>, vector<1x16x128xf32>
      %19 = vector.shape_cast %18 : vector<1x16x128xf32> to vector<16x128xf32>
      %20 = vector.shape_cast %16 : vector<16x128xf32> to vector<1x16x128xf32>
      tpu.vector_store %arg9[%17, %c0_10, %c0_11], %20 {strides = array<i32>} : memref<2x16x128xf32, #tpu.memory_space<vmem>>, vector<1x16x128xf32>,
      %c0_12 = arith.constant 0 : index
      %c0_13 = arith.constant 0 : index
      %21 = vector.load %arg7[%c0_12, %c0_13] : memref<16x1xf32, #tpu.memory_space<vmem>>, vector<16x1xf32>
      %cst_14 = arith.constant dense<0xFF800000> : vector<16xf32>
      %22 = vector.multi_reduction <maximumf>, %16, %cst_14 [1] : vector<16x128xf32> to vector<16xf32>
      %23 = vector.shape_cast %22 : vector<16xf32> to vector<16x1xf32>
      %24 = arith.maximumf %21, %23 : vector<16x1xf32>
      %25 = arith.subf %21, %24 : vector<16x1xf32>
      %26 = math.exp %25 : vector<16x1xf32>
      %c0_15 = arith.constant 0 : index
      %c0_16 = arith.constant 0 : index
      %27 = vector.load %arg8[%c0_15, %c0_16] : memref<16x1xf32, #tpu.memory_space<vmem>>, vector<16x1xf32>
      %28 = arith.mulf %26, %27 : vector<16x1xf32>
      %29 = vector.broadcast %24 : vector<16x1xf32> to vector<16x128xf32>
      %30 = arith.subf %16, %29 : vector<16x128xf32>
      %31 = math.exp %30 : vector<16x128xf32>
      %cst_17 = arith.constant dense<0.000000e+00> : vector<16xf32>
      %32 = vector.multi_reduction <add>, %31, %cst_17 [1] : vector<16x128xf32> to vector<16xf32>
      %33 = vector.shape_cast %32 : vector<16xf32> to vector<16x1xf32>
      %34 = arith.addf %28, %33 : vector<16x1xf32>
      %c0_18 = arith.constant 0 : index
      %c0_19 = arith.constant 0 : index
      %35 = vector.load %arg8[%c0_18, %c0_19] : memref<16x1xf32, #tpu.memory_space<vmem>>, vector<16x1xf32>
      tpu.vector_store %arg8[%c0_18, %c0_19], %34 {strides = array<i32>} : memref<16x1xf32, #tpu.memory_space<vmem>>, vector<16x1xf32>,
      %c0_20 = arith.constant 0 : index
      %c0_21 = arith.constant 0 : index
      %36 = vector.load %arg7[%c0_20, %c0_21] : memref<16x1xf32, #tpu.memory_space<vmem>>, vector<16x1xf32>
      tpu.vector_store %arg7[%c0_20, %c0_21], %24 {strides = array<i32>} : memref<16x1xf32, #tpu.memory_space<vmem>>, vector<16x1xf32>,
    } else {
    }
    %c1_i32 = arith.constant 1 : i32
    %8 = arith.cmpi eq, %arg1, %c1_i32 : i32
    %9 = arith.extui %8 : i1 to i32
    %c0_i32_4 = arith.constant 0 : i32
    %10 = arith.cmpi ne, %9, %c0_i32_4 : i32
    scf.if %10 {
      %c0 = arith.constant 0 : index
      %c0_5 = arith.constant 0 : index
      %11 = vector.load %arg7[%c0, %c0_5] : memref<16x1xf32, #tpu.memory_space<vmem>>, vector<16x1xf32>
      %c0_6 = arith.constant 0 : index
      %c0_7 = arith.constant 0 : index
      %12 = vector.load %arg8[%c0_6, %c0_7] : memref<16x1xf32, #tpu.memory_space<vmem>>, vector<16x1xf32>
      %13 = math.log %12 : vector<16x1xf32>
      %14 = arith.addf %11, %13 : vector<16x1xf32>
      %15 = arith.index_cast %arg2 : i32 to index
      %c0_8 = arith.constant 0 : index
      %c0_9 = arith.constant 0 : index
      %16 = vector.load %arg9[%15, %c0_8, %c0_9] : memref<2x16x128xf32, #tpu.memory_space<vmem>>, vector<1x16x128xf32>
      %17 = vector.shape_cast %16 : vector<1x16x128xf32> to vector<16x128xf32>
      %18 = vector.broadcast %14 : vector<16x1xf32> to vector<16x128xf32>
      %19 = arith.subf %17, %18 : vector<16x128xf32>
      %c0_10 = arith.constant 0 : index
      %c0_11 = arith.constant 0 : index
      %20 = vector.load %arg6[%c0_10, %c0_11] : memref<16x128xf32, #tpu.memory_space<vmem>>, vector<16x128xf32>
      tpu.vector_store %arg6[%c0_10, %c0_11], %19 {strides = array<i32>} : memref<16x128xf32, #tpu.memory_space<vmem>>, vector<16x128xf32>,
    } else {
    }
    return
  }
  func.func @transform_0(%arg0: i32, %arg1: i32, %arg2: i32) -> (i32, i32) {
    %c0_i32 = arith.constant 0 : i32
    %c0_i32_0 = arith.constant 0 : i32
    return %arg0, %c0_i32 : i32, i32
  }
  func.func @transform_1(%arg0: i32, %arg1: i32, %arg2: i32) -> (i32, i32) {
    %c1_i32 = arith.constant 1 : i32
    %0 = arith.subi %c1_i32, %arg1 : i32
    %1 = arith.muli %arg2, %0 : i32
    %c1_i32_0 = arith.constant 1 : i32
    %2 = arith.muli %c1_i32_0, %arg1 : i32
    %3 = arith.addi %1, %2 : i32
    %c0_i32 = arith.constant 0 : i32
    %c0_i32_1 = arith.constant 0 : i32
    return %c0_i32, %3 : i32, i32
  }
  func.func @transform_2(%arg0: i32, %arg1: i32, %arg2: i32) -> (i32, i32) {
    %c1_i32 = arith.constant 1 : i32
    %0 = arith.subi %c1_i32, %arg1 : i32
    %1 = arith.muli %arg2, %0 : i32
    %c1_i32_0 = arith.constant 1 : i32
    %2 = arith.muli %c1_i32_0, %arg1 : i32
    %3 = arith.addi %1, %2 : i32
    %c0_i32 = arith.constant 0 : i32
    %c0_i32_1 = arith.constant 0 : i32
    return %c0_i32, %3 : i32, i32
  }
  func.func @transform_3(%arg0: i32, %arg1: i32, %arg2: i32) -> (i32, i32) {
    %0 = arith.muli %arg2, %arg1 : i32
    %c0_i32 = arith.constant 0 : i32
    return %arg0, %0 : i32, i32
  }
}

</mosaic_0001>

<bundles_post_ra>
// kernel: masked_log_model.1
= control target key start
LH: loop header
LB: loop body
LE: loop exit
PB: predicated region body
PF: predicated region fallthrough
CT: control target
= control target key end

     0   :  { %s1129_s0 = inlined_call_operand.vmem [shape: bf16[32,32], index: 0, kind: input, shape index: {}]   ;;  %s1130_s1 = inlined_call_operand.vmem [shape: bf16[32,256], index: 1, kind: input, shape index: {}]   ;;  %s1131_s2 = inlined_call_operand.vmem [shape: f32[1,256], index: 2, kind: input, shape index: {}]   ;;  %s1132_s3 = inlined_call_operand.hbm [shape: f32[32,256], index: 3, kind: output, shape index: {}]  }
   0x1   :  { %1139 = sst [smem:[#allocation13_spill]] %s1130_s1 }
   0x2   :  { %1140 = sst [smem:[#allocation14_spill]] %s1131_s2 }
   0x3   :  { %1141 = sst [smem:[#allocation15_spill]] %s1132_s3 }
   0x4   :  { %8 = vsyncpa [#allocation7], 0 }
   0x5   :  { %10 = vsyncpa [#allocation7 + $0x1], 0  ;;  %s910_s12 = smov 0   ;;  %s912_s13 = smov 0  }
   0x6   :  { %s914_s14 = smov 0   ;;  %s916_s15 = smov 0  }
   0x7   :  { %s918_s16 = smov 0   ;;  %s920_s17 = smov 0  }
   0x8   :  { %s922_s18 = smov 0   ;;  %s924_s19 = smov 0  }
   0x9   :  { %s926_s20 = smov 0   ;;  %s928_s21 = smov 0  }
   0xa   :  { %s930_s22 = smov 0   ;;  %s932_s23 = smov 0  }
   0xb LB: > { %1142 = sst [smem:[#allocation9_spill]] %s869_s20  ;;  %s28_s26 = sadd.s32 1, %s869_s20  ;;  %s881_s23 = sphi %s932_s23, %s16_s23   ;;  %s877_s22 = sphi %s930_s22, %s1168_s22   ;;  %s873_s21 = sphi %s928_s21, %s1167_s21   ;;  %s869_s20 = sphi %s926_s20, %s1166_s20   ;;  %s865_s19 = sphi %s924_s19, %s1165_s19   ;;  %s861_s18 = sphi %s922_s18, %s1157_s18   ;;  %s857_s17 = sphi %s920_s17, %s1156_s17   ;;  %s853_s16 = sphi %s918_s16, %s1164_s16   ;;  %s849_s15 = sphi %s916_s15, %s1163_s15   ;;  %s845_s14 = sphi %s914_s14, %s1162_s14   ;;  %s841_s13 = sphi %s912_s13, %s1161_s13   ;;  %s837_s12 = sphi %s910_s12, %s1160_s12  }
   0xc   : > { %1143 = sst [smem:[#allocation10_spill]] %s873_s21  ;;  %s31_s27 = sadd.s32 1, %s873_s21 }
   0xd   : > { %p29_p0 = scmp.ge.s32.totalorder %s28_s26, 2  ;;  %s35_s28 = sadd.s32 1, %s877_s22 }
   0xe   : > { %s65_s29 = ssub.s32 1, %s873_s21  ;;  %s74_s30 = sadd.s32 1, %s853_s16 }
   0xf   : > { %s1170_s26 = smov (%p29_p0, %s28_s26), 0  ;;  %s1172_s27 = smov (!%p29_p0, %s31_s27), %s873_s21 }
  0x10   : > { %1144 = sst [smem:[#allocation11_spill]] %s1170_s26  ;;  %s66_s4 = smul.u32 %s869_s20, %s65_s29 }
  0x11   : > { %p81_p1 = scmp.ne.s32.totalorder %s853_s16, %s849_s15  ;;  %p33_p2 = scmp.ge.s32.totalorder %s1172_s27, 2 }
  0x12   : > { %p82_p3 = scmp.eq.s32.totalorder %s881_s23, 0  ;;  %s985_s5 = sadd.s32 %s873_s21, %s66_s4 }
  0x13   : > { %s129_s6 = smul.u32 %s869_s20, %s873_s21  ;;  %s1174_s27 = smov (%p33_p2, %s1172_s27), 0 }
  0x14   : > { %s1176_s28 = smov (!%p33_p2, %s35_s28), %s877_s22  ;;  %s68_s7 = ssub.s32 1, %s1174_s27 }
  0x15   : > { %p993_p4 = por %p82_p3, %p81_p1  ;;  %p37_p5 = scmp.ge.s32.totalorder %s1176_s28, 2 }
  0x16   : > { %s69_s9 = smul.u32 %s68_s7, %s1170_s26  ;;  %s136_s11 = sadd.s32 1, %s845_s14 }
  0x17   : > { %s130_s10 = smul.u32 %s1174_s27, %s1170_s26  ;;  %s1178_s28 = smov (%p37_p5, %s1176_s28), 0 }
  0x18   : > { %1146 = sst [smem:[#allocation12_spill]] %s1178_s28  ;;  %s70_s29 = sadd.s32 %s69_s9, %s1174_s27 }
  0x19   : > { %s132_s4 = ssub.s32 %s129_s6, %s130_s10  ;;  %s71_s25 = ssub.s32 %s985_s5, %s70_s29 }
  0x1a   : > { %s131_s24 = ssub.s32 %s877_s22, %s1178_s28  ;;  %p72_p6 = scmp.eq.s32.totalorder %s71_s25, 0 }
  0x1b   : > { %s133_s21 = sor.u32 %s132_s4, %s131_s24  ;;  %p146_p8 = scmp.ne.s32.totalorder %s845_s14, %s841_s13 }
  0x1c   : > { %p134_p7 = scmp.eq.s32.totalorder %s133_s21, 0  ;;  %s1147_s2 = sadd.s32 4294967295, %s881_s23  }
  0x1d   : > { %s1010_s20 = scalar_select %p72_p6, %s853_s16, %s74_s30  }
  0x1e   : > { %s1013_s3 = scalar_select %p134_p7, %s845_s14, %s136_s11  }
  0x1f   : > { %p147_p9 = scmp.eq.s32.totalorder %s1147_s2, 7  ;;  %p152_p10 = scmp.ne.s32.totalorder %s841_s13, %s837_s12 }
  0x20   : > { %s1148_s7 = sadd.s32 4294967294, %s881_s23   ;;  %p594_p0 = scmp.ge.s32.totalorder %s881_s23, 8 }
  0x21   : > { %p153_p11 = scmp.eq.s32.totalorder %s1148_s7, 7  ;;  %p1021_p12 = por %p147_p9, %p146_p8 }
  0x22   : > { %169 = sbr.rel (%p594_p0) target bundleno = 53 (0x35), region = 16 }
  0x23   : > { %p1025_p13 = por %p153_p11, %p152_p10 }
  0x27   : > { %181 = sbr.rel (!%p993_p4) target bundleno = 53 (0x35), region = 24  ;;  %s183_s2 = sand.u32 (%p993_p4), 1, %s853_s16  }
  0x28   : > { %s596_s21 = sshll.u32 (%p993_p4), %s985_s5, 2  ;;  %s595_s24 = sshll.u32 (%p993_p4), %s183_s2, 4 }
  0x29   : > { %s1151_s1 = sld [smem:[#allocation13_spill]] (%p993_p4)  ;;  %s185_s10 = scalar_lea.vmem (%p993_p4), [#allocation5], %s595_s24 }
  0x2f   : > { %s190_s9 = scalar_lea.vmem %s1151_s1, %s596_s21 }
  0x30   : > { %v207_v0 = vld [vmem:[%s190_s9] sm:$0xf]  ;;  %v209_v1 = vld [vmem:[%s190_s9 + $0x8] sm:$0xf]  ;;  %v211_v2 = vld [vmem:[%s190_s9 + $0x10] sm:$0xf] }
  0x31   : > { %208 = vst [vmem:[%s185_s10] sm:$0xf] %v207_v0  ;;  %v213_v3 = vld [vmem:[%s190_s9 + $0x18] sm:$0xf] }
  0x32   : > { %210 = vst [vmem:[%s185_s10 + $0x4] sm:$0xf] %v209_v1 }
  0x33   : > { %212 = vst [vmem:[%s185_s10 + $0x8] sm:$0xf] %v211_v2 }
  0x34   : > { %214 = vst [vmem:[%s185_s10 + $0xc] sm:$0xf] %v213_v3 }
  0x35 PF: > { %p597_p1 = scmp.ge.s32.totalorder %s881_s23, 1  ;;  %p257_p2 = scmp.lt.s32.totalorder %s881_s23, 9 }
  0x37   : > { %p258_p3 = pnand %p597_p1, %p257_p2 }
  0x38   : > { %s264_s5 = sand.u32 (!%p258_p3), 1, %s849_s15   ;;  %s1137_s8 = sand.u32 (!%p258_p3), 1, %s841_s13  }
  0x39   : > { %261 = sbr.rel (%p258_p3) target bundleno = 758 (0x2f6), region = 69  ;;  %s1041_s11 = sshll.u32 (!%p258_p3), %s264_s5, 4 }
  0x3a   : > { %s599_s29 = sshll.u32 (!%p258_p3), %s1137_s8, 4  ;;  %s600_s4 = sshll.u32 (!%p258_p3), %s865_s19, 1 }
  0x3b   : > { %s307_s7 = ssub.s32 (!%p258_p3), 1, %s861_s18  ;;  %p299_p4 = scmp.lt.s32.totalorder (!%p258_p3), %s600_s4, 3 }
  0x3c   : > { %s308_s2 = smul.u32 (!%p258_p3), %s857_s17, %s307_s7  ;;  %p319_p5 = scmp.eq.s32.totalorder (!%p258_p3), %s861_s18, 0 }
  0x3d   : > { %p320_p6 = scmp.eq.s32.totalorder (!%p258_p3), %s857_s17, 0  ;;  %s1152_s5 = sld [smem:[#allocation14_spill]] (!%p258_p3) }
  0x3e   : > { %s1180_s4 = smov (!%p299_p4, %s600_s4), 3  ;;  %s309_s21 = sadd.s32 %s861_s18, %s308_s2 }
  0x3f   : > { %p321_p7 = pnand %p320_p6, %p319_p5  ;;  %s601_s24 = sshll.u32 %s1180_s4, 2 }
  0x40   : > { %p310_p8 = scmp.lt.s32.totalorder %s309_s21, 1  ;;  %s302_s15 = scalar_lea.vmem %s1129_s0, %s601_s24 }
  0x41   : > { %s266_s1 = scalar_lea.vmem [#allocation5], %s1041_s11  ;;  %s1058_s28 = scalar_lea.vmem [#allocation6], %s599_s29 }
  0x42   : > { %s1182_s21 = smov (!%p310_p8, %s309_s21), 1  ;;  %324 = sbr.rel (%p321_p7) target bundleno = 76 (0x4c), region = 77 }
  0x43   : > { %s312_s8 = scalar_lea.vmem %s1152_s5, %s1182_s21 }
  0x47   : > { %vm325_vm0 = vcmask 7168   ;;  %v883_v4 = vmov -inf   ;;  %v884_v5 = vmov 0.0  }
  0x48   : > { %326 = vst.msk [vmem:[#allocation2] sm:$0xff] %vm325_vm0, %v883_v4 }
  0x49   : > { %327 = vst.msk [vmem:[#allocation2 + $0x8] sm:$0xff] %vm325_vm0, %v883_v4 }
  0x4a   : > { %328 = vst.msk [vmem:[#allocation3] sm:$0xff] %vm325_vm0, %v884_v5 }
  0x4b   : > { %329 = vst.msk [vmem:[#allocation3 + $0x8] sm:$0xff] %vm325_vm0, %v884_v5 }
  0x4c PF: > { %p602_p9 = scmp.ne.s32.totalorder %s861_s18, 0 }
  0x4d   : > { %s616_s11 = sshll.u32 (!%p602_p9), %s857_s17, 4 }
  0x4e   : > { %332 = sbr.rel (%p602_p9) target bundleno = 590 (0x24e), region = 81  ;;  %s379_s29 = scalar_lea.vmem (!%p602_p9), [#allocation4], %s616_s11 }
  0x53   : > { %v627_v6 = vld [vmem:[%s266_s1 + $0x8] sm:$0xff]  ;;  %v626_v7 = vld [vmem:[%s266_s1] sm:$0xff]  ;;  %vm360_vm1 = vcmask 261120   ;;  %v885_v14 = vmov 0   ;;  %vm422_vm2 = vcmask 7168  }
  0x54   : > { %370 = vmatpush.bf16.msra.mxu0 %v627_v6  ;;  %v625_v8 = vld [vmem:[%s302_s15] sm:$0xff]  ;;  %739 = vset.pattern.permute.xlu1 %v885_v14  ;;  %v383_v19 = vld [vmem:[#allocation2 + $0x8] sm:$0xff]  ;;  %v396_v34 = vld [vmem:[#allocation3] sm:$0xff] }
  0x55   : > { %v741_v9 = vld [vmem:[%s312_s8] ss:$0 sm:$0xff]  ;;  %740 = vset.pattern.permute.xlu0 %v885_v14  ;;  %v397_v39 = vld [vmem:[#allocation3 + $0x8] sm:$0xff] }
  0x56   : > { %v382_v15 = vld [vmem:[#allocation2] sm:$0xff] }
  0x58   : > { %371 = vmatpush.bf16.msra.mxu0 %v626_v7 }
  0x5b   : > { %615 = vmatmul.msk.bf16.vlgmr.msra.gmra.mxu0 %vm360_vm1, %v625_v8 }
  0xd8   : > { %v373_v10 = vpop.f32.mrf.mxu0 }
  0xd9   : > { %v374_v11 = vadd.f32 %v741_v9, %v373_v10 }
  0xdb   : > { %380 = vst [vmem:[%s379_s29] sm:$0xff] %v374_v11  ;;  %384 = vmax.xlane.f32.xlu0 %v374_v11 }
  0xe0   : > { %v375_v12 = vpop.f32.mrf.mxu0 }
  0xe1   : > { %v376_v13 = vadd.f32 %v741_v9, %v375_v12 }
  0xe3   : > { %381 = vst [vmem:[%s379_s29 + $0x8] sm:$0xff] %v376_v13  ;;  %386 = vmax.xlane.f32.xlu0 %v376_v13 }
 0x14e   : > { %v385_v16 = vpop.xlane.xlu0 %384 }
 0x14f   : > { %v388_v17 = vmax.f32 %v382_v15, %v385_v16 }
 0x151   : > { %v390_v18 = vsub.f32 %v382_v15, %v388_v17  ;;  %425 = vst.msk [vmem:[#allocation2] sm:$0xff] %vm422_vm2, %v388_v17  ;;  %402 = vperm.xlu1 %739, %v388_v17  }
 0x153   : > { %v392_v31 = vmul.f32 1.442695, %v390_v18 }
 0x156   : > { %v387_v20 = vpop.xlane.xlu0 %386 }
 0x157   : > { %v389_v21 = vmax.f32 %v383_v19, %v387_v20 }
 0x159   : > { %v391_v22 = vsub.f32 %v383_v19, %v389_v21  ;;  %426 = vst.msk [vmem:[#allocation2 + $0x8] sm:$0xff] %vm422_vm2, %v389_v21  ;;  %407 = vperm.xlu1 %739, %v389_v21  }
 0x15b   : > { %v394_v32 = vmul.f32 1.442695, %v391_v22 }
 0x1c3   : > { %v403_v23 = vpop.permute.xlu1 %402 }
 0x1c4   : > { %v410_v24 = vsub.f32 %v374_v11, %v403_v23 }
 0x1c6   : > { %v412_v25 = vmul.f32 1.442695, %v410_v24 }
 0x1c8   : > { %742 = vpow2.f32 %v412_v25 }
 0x1cb   : > { %v408_v26 = vpop.permute.xlu1 %407 }
 0x1cc   : > { %v411_v27 = vsub.f32 %v376_v13, %v408_v26 }
 0x1ce   : > { %v743_v28 = vpop.eup %742  ;;  %v414_v29 = vmul.f32 1.442695, %v411_v27 }
 0x1cf   : > { %416 = vadd.xlane.f32.xlu2 %v743_v28 }
 0x1d0   : > { %744 = vpow2.f32 %v414_v29 }
 0x1d1   : > { %746 = vpow2.f32 %v392_v31 }
 0x1d2   : > { %748 = vpow2.f32 %v394_v32 }
 0x1d6   : > { %v745_v30 = vpop.eup %744 }
 0x1d7   : > { %418 = vadd.xlane.f32.xlu2 %v745_v30  ;;  %v747_v33 = vpop.eup %746 }
 0x1d8   : > { %v398_v35 = vmul.f32 %v747_v33, %v396_v34  ;;  %v749_v38 = vpop.eup %748 }
 0x1d9   : > { %v399_v40 = vmul.f32 %v749_v38, %v397_v39 }
 0x242   : > { %v417_v36 = vpop.xlane.xlu2 %416 }
 0x243   : > { %v420_v37 = vadd.f32 %v417_v36, %v398_v35 }
 0x245   : > { %423 = vst.msk [vmem:[#allocation3] sm:$0xff] %vm422_vm2, %v420_v37 }
 0x24a   : > { %v419_v41 = vpop.xlane.xlu2 %418 }
 0x24b   : > { %v421_v42 = vadd.f32 %v419_v41, %v399_v40 }
 0x24d   : > { %424 = vst.msk [vmem:[#allocation3 + $0x8] sm:$0xff] %vm422_vm2, %v421_v42 }
 0x24e PF: > { %p617_p10 = scmp.ne.s32.totalorder %s861_s18, 1 }
 0x24f   : > { %s618_s1 = sshll.u32 (!%p617_p10), %s857_s17, 4 }
 0x250   : > { %430 = sbr.rel (%p617_p10) target bundleno = 735 (0x2df), region = 85  ;;  %s442_s8 = scalar_lea.vmem (!%p617_p10), [#allocation4], %s618_s1 }
 0x255   : > { %v433_v43 = vld [vmem:[#allocation3] sm:$0xff]  ;;  %v886_v44 = vmov 0   ;;  %v434_v45 = vld [vmem:[#allocation3 + $0x8] sm:$0xff]  ;;  %v431_v47 = vld [vmem:[#allocation2] sm:$0xff] }
 0x256   : > { %750 = vset.pattern.permute.xlu0 %v886_v44  ;;  %751 = vlog2.f32 %v433_v43  ;;  %v432_v52 = vld [vmem:[#allocation2 + $0x8] sm:$0xff]  ;;  %v443_v54 = vld [vmem:[%s442_s8] sm:$0xff] }
 0x257   : > { %753 = vlog2.f32 %v434_v45  ;;  %v444_v57 = vld [vmem:[%s442_s8 + $0x8] sm:$0xff] }
 0x25c   : > { %v752_v46 = vpop.eup %751 }
 0x25d   : > { %v436_v48 = vmul.f32 0.6931472, %v752_v46  ;;  %v754_v49 = vpop.eup %753 }
 0x25e   : > { %v438_v51 = vmul.f32 0.6931472, %v754_v49 }
 0x25f   : > { %v439_v50 = vadd.f32 %v436_v48, %v431_v47 }
 0x260   : > { %v440_v53 = vadd.f32 %v438_v51, %v432_v52 }
 0x261   : > { %447 = vperm.xlu0 %750, %v439_v50  }
 0x269   : > { %452 = vperm.xlu0 %750, %v440_v53  }
 0x2d3   : > { %v448_v55 = vpop.permute.xlu0 %447 }
 0x2d4   : > { %v455_v56 = vsub.f32 %v443_v54, %v448_v55 }
 0x2d6   : > { %457 = vst [vmem:[%s1058_s28] sm:$0xff] %v455_v56 }
 0x2db   : > { %v453_v58 = vpop.permute.xlu0 %452 }
 0x2dc   : > { %v456_v59 = vsub.f32 %v444_v57, %v453_v58 }
 0x2de   : > { %458 = vst [vmem:[%s1058_s28 + $0x8] sm:$0xff] %v456_v59 }
 0x2df PF: > { %s467_s4 = smul.u32 %s857_s17, %s861_s18  ;;  %s628_s7 = sshll.u32 %s865_s19, 2 }
 0x2e0   : > { %s475_s2 = sshll.u32 %s1058_s28, 4  ;;  %s1153_s15 = sld [smem:[#allocation15_spill]]  ;;  %s476_s2 = int_to_ptr.vmem [resolvable:$true] %s475_s2 }
 0x2e1   : > { %s472_s21 = sadd.s32 %s628_s7, %s467_s4  ;;  %s1155_s11 = sand.u32 1, %s841_s13  }
 0x2e2   : > { %s622_s24 = sshll.u32 %s472_s21, 3  ;;  %s460_s29 = scalar_lea.sflag [#allocation7], %s1155_s11 }
 0x2e6   : > { %s1154_s9 = smov %s1153_s15  ;;  %s474_s10 = scalar_lea.hbm %s1153_s15, %s622_s24 }
 0x2e7   : > { %s477_s5 = sshll.u32 %s474_s10, 4  ;;  %s775_s19 = scalar_lea.hbm %s1154_s9, 64  ;;  %s478_s5 = int_to_ptr.hbm [resolvable:$true] %s477_s5 }
 0x2e8   : > { %s769_s1 = sshra.s32 %s478_s5, 4  ;;  %s770_s1 = int_to_ptr.hbm [resolvable:$true] %s769_s1 }
 0x2e9   : > { %s771_s8 = scalar_lea.hbm %s770_s1, 16  ;;  %p776_p2 = scmp.lt.s32.totalorder %s770_s1, %s1154_s9 }
 0x2ea   : > { %p772_p11 = scmp.ne.s32.totalorder %s770_s1, %s771_s8  ;;  %p777_p3 = scmp.lt.s32.totalorder %s775_s19, %s771_s8 }
 0x2ec   : > { %p773_p0 = pnand %p772_p11, %p1021_p12  ;;  %p778_p4 = por %p777_p3, %p776_p2 }
 0x2ee   : > { %p774_p1 = pneg %p773_p0 }
 0x2f0   : > { %p779_p5 = pnand %p778_p4, %p774_p1 }
 0x2f2   : > { %782 = shalt.err (!%p779_p5)
}
 0x2f3   : > { %s887_s7 = smov 128   ;;  %s888_s21 = smov 256  }
 0x2f4   : > { %s889_s24 = smov 8  }
 0x2f5   : > { %629 = dma.vmem_to_hbm [thread:$0]  (%p1021_p12), %s476_s2, 256, %s478_s5, %s460_s29, %s887_s7, %s888_s21, %s889_s24  }
 0x2f6 PF: > { %p635_p6 = scmp.ge.s32.totalorder %s881_s23, 2  ;;  %s492_s25 = sand.u32 1, %s837_s12  }
 0x2f7   : > { %s493_s30 = scalar_lea.sflag [#allocation7], %s492_s25 }
 0x2f8   : > { %p632_p7 = pnand %p635_p6, %p1025_p13 }
 0x2fa   : > { %p633_p8 = pneg %p632_p7 }
 0x2fc   : > { %832 = dma.done.wait (%p633_p8), %s493_s30, 256  }
 0x2fd   : > { %834 = vsyncadd (%p633_p8), %s493_s30, 4294967040  ;;  %s16_s23 = sadd.s32 1, %s881_s23   ;;  %s1156_s17 = sld [smem:[#allocation9_spill]] }
 0x2fe   : > { %p13_p9 = scmp.ge.s32.totalorder %s16_s23, 10   ;;  %s1157_s18 = sld [smem:[#allocation10_spill]] }
 0x2ff   : > { %s1158_s26 = sld [smem:[#allocation11_spill]]  ;;  %s1160_s12 = smov %s841_s13 }
 0x300   : > { %s1159_s2 = sld [smem:[#allocation12_spill]]  ;;  %s1161_s13 = smov %s845_s14 }
 0x301   : > { %s1162_s14 = smov %s1013_s3  ;;  %s1163_s15 = smov %s853_s16 }
 0x302   : > { %s1164_s16 = smov %s1010_s20  ;;  %s1165_s19 = smov %s877_s22 }
 0x303   : > { %s1167_s21 = smov %s1174_s27  ;;  %15 = sbr.rel (!%p13_p9) target bundleno = 11 (0xb), region = 133 }
 0x305   : > { %s1166_s20 = smov %s1158_s26 }
 0x306   : > { %s1168_s22 = smov %s1159_s2 }
 0x308   :  { %499 = vsyncpa [#allocation7], 1 }
 0x309   :  { %501 = vsyncpa [#allocation7 + $0x1], 1 }

</bundles_post_ra>
